<compile_context>
chip_gen: v7x
topology: tpu7x:2x2x1
jax: 0.10.0
libtpu: 0.0.40
codegen_flags: <defaults>
</compile_context>

<pallas_src>
import jax
import jax.numpy as jnp
from jax.experimental import pallas as pl
from jax.experimental.pallas import tpu as pltpu


def _pick_batch_tile(B):
    """Batch-tile size.

    B < 512   : one tile == whole batch (block equals full array dims).
    512..1023 : 256-row tiles (>=2 grid steps for v7x 2-TC sharding, 256-aligned
                for the v6e/v7x MXU).
    >= 1024   : 512-row tiles (still <=~3 MiB of f32 temporaries -> safe under
                v5e's 16 MiB scoped-VMEM default, no vmem_limit override needed).
    """
    if B < 512:
        return B
    if B < 1024:
        return 256
    return 512


def _critic_kernel(s_ref, a_ref,
                   w1s_ref, w1a_ref, b1_ref,
                   w2_ref, b2_ref,
                   w3_ref, b3_ref,
                   w4_ref, b4_ref,
                   o_ref):
    # ~0.43 MiB of bf16 weights + one batch tile of activations fit easily in
    # VMEM; each grid step is 4 MXU matmuls + VPU bias/ReLU + one XLU reduce.
    s = s_ref[...].astype(jnp.bfloat16)
    a = a_ref[...].astype(jnp.bfloat16)

    # fc1 with torch.cat folded in: [s, a] @ W1 == s @ W1[:S] + a @ W1[S:]
    # (kept as two small-K matmuls; fusing to one K=32 matmul is a negligible
    #  win next to the K=512/256 layers and would need an unaligned lane concat)
    h1 = (jnp.dot(s, w1s_ref[...], preferred_element_type=jnp.float32)
          + jnp.dot(a, w1a_ref[...], preferred_element_type=jnp.float32)
          + b1_ref[...])
    h1 = jnp.maximum(h1, 0.0)

    h2 = jnp.dot(h1.astype(jnp.bfloat16), w2_ref[...],
                 preferred_element_type=jnp.float32) + b2_ref[...]
    h2 = jnp.maximum(h2, 0.0)

    h3 = jnp.dot(h2.astype(jnp.bfloat16), w3_ref[...],
                 preferred_element_type=jnp.float32) + b3_ref[...]
    h3 = jnp.maximum(h3, 0.0)

    # fc4 (256 -> 1): VPU broadcast-multiply + cross-lane (XLU) reduce instead
    # of an N=1 MXU matmul; result is written lane-major -> (1, TB) lane-dense
    # output block (unmasked full-lane stores).
    q = jnp.sum(h3 * w4_ref[...], axis=-1)                 # (TB,) f32
    o_ref[...] = (q.reshape(1, -1) + b4_ref[...]).astype(o_ref.dtype)


def init_critic_params(key, state_dim, action_dim):
    """PyTorch-default-style init U(-1/sqrt(fan_in), 1/sqrt(fan_in)).

    Weights stored ONCE, pre-transposed to (in_features, out_features):
      fc1 split into state rows / action rows, bf16.
      fc2/fc3 bf16.
      fc4 stored as an f32 row vector (1, 256) (used on the VPU, not the MXU).
    Biases are f32, shape (1, out) so they broadcast along the batch axis.
    """
    S, A = state_dim, action_dim
    dims = [(S + A, 512), (512, 256), (256, 256), (256, 1)]
    raw = []
    for (in_f, out_f) in dims:
        key, kw, kb = jax.random.split(key, 3)
        bound = 1.0 / jnp.sqrt(jnp.float32(in_f))
        w = jax.random.uniform(kw, (in_f, out_f), jnp.float32, -bound, bound)
        b = jax.random.uniform(kb, (1, out_f), jnp.float32, -bound, bound)
        raw.append((w, b))

    (w1, b1), (w2, b2), (w3, b3), (w4, b4) = raw
    bf = jnp.bfloat16
    params = (
        (w1[:S].astype(bf), w1[S:].astype(bf), b1),   # fc1 split: state / action
        (w2.astype(bf), b2),
        (w3.astype(bf), b3),
        (jnp.transpose(w4), b4),                      # fc4 as f32 row (1, 256)
    )
    return params


def critic_forward(state, action, params, batch_tile=None):
    """state: (B, S) f32, action: (B, A) f32 -> q: (B, 1) f32."""
    B, S = state.shape
    A = action.shape[1]
    (w1s, w1a, b1), (w2, b2), (w3, b3), (w4_row, b4) = params

    TB = batch_tile if batch_tile is not None else _pick_batch_tile(B)
    num_tiles = pl.cdiv(B, TB)   # no wrapper pad: partial last tile is allowed

    batch_map = lambda i: (i, 0)   # activations: stream per batch tile
    rep_map = lambda i: (0, 0)     # weights / biases: VMEM-resident (same block)

    in_specs = [
        pl.BlockSpec((TB, S), batch_map),
        pl.BlockSpec((TB, A), batch_map),
        pl.BlockSpec(w1s.shape, rep_map),
        pl.BlockSpec(w1a.shape, rep_map),
        pl.BlockSpec(b1.shape, rep_map),
        pl.BlockSpec(w2.shape, rep_map),
        pl.BlockSpec(b2.shape, rep_map),
        pl.BlockSpec(w3.shape, rep_map),
        pl.BlockSpec(b3.shape, rep_map),
        pl.BlockSpec(w4_row.shape, rep_map),
        pl.BlockSpec(b4.shape, rep_map),
    ]
    # Lane-dense output: one (1, TB) row per batch tile.
    out_spec = pl.BlockSpec((1, TB), lambda i: (i, 0))

    q_t = pl.pallas_call(
        _critic_kernel,
        out_shape=jax.ShapeDtypeStruct((num_tiles, TB), jnp.float32),
        grid=(num_tiles,),
        in_specs=in_specs,
        out_specs=out_spec,
        compiler_params=pltpu.CompilerParams(
            dimension_semantics=("parallel",)),   # v7x: shard batch over 2 TCs
    )(state, action, w1s, w1a, b1, w2, b2, w3, b3, w4_row, b4)

    # (num_tiles, TB) row-major == batch order; drop tail rows (>= B), add col.
    return q_t.reshape(num_tiles * TB, 1)[:B]


def critic_forward_ref(state, action, params):
    """Pure-JAX f32 reference (same bf16-stored weights, f32 math)."""
    (w1s, w1a, b1), (w2, b2), (w3, b3), (w4_row, b4) = params
    f = lambda w: w.astype(jnp.float32)
    x = jnp.maximum(state @ f(w1s) + action @ f(w1a) + b1, 0.0)
    x = jnp.maximum(x @ f(w2) + b2, 0.0)
    x = jnp.maximum(x @ f(w3) + b3, 0.0)
    return x @ jnp.transpose(w4_row) + b4


if __name__ == "__main__":
    key = jax.random.PRNGKey(0)
    state_dim, action_dim = 24, 8

    k_params, k_s, k_a = jax.random.split(key, 3)
    params = init_critic_params(k_params, state_dim, action_dim)

    # Test 1: small batch -> single full-batch tile.
    batch = 4
    state = jax.random.normal(k_s, (batch, state_dim), jnp.float32)
    action = jax.random.normal(k_a, (batch, action_dim), jnp.float32)
    q = jax.block_until_ready(critic_forward(state, action, params))
    q_ref = critic_forward_ref(state, action, params)
    assert q.shape == (batch, 1), q.shape
    # bf16 weights + bf16 matmul inputs (f32 accumulation): relaxed tolerance.
    assert jnp.allclose(q, q_ref, atol=5e-2, rtol=5e-2), (q, q_ref)

    # Test 2: multi-tile grid with a partial last tile (exercises the
    # no-pad cdiv path and the lane-dense transposed output layout).
    batch2 = 20
    k_s2, k_a2 = jax.random.split(k_s)
    state2 = jax.random.normal(k_s2, (batch2, state_dim), jnp.float32)
    action2 = jax.random.normal(k_a2, (batch2, action_dim), jnp.float32)
    q2 = jax.block_until_ready(critic_forward(state2, action2, params, batch_tile=8))
    q2_ref = critic_forward_ref(state2, action2, params)
    assert q2.shape == (batch2, 1), q2.shape
    assert jnp.allclose(q2, q2_ref, atol=5e-2, rtol=5e-2), (q2, q2_ref)

    print("KERNEL_OK")
</pallas_src>

<mosaic_0001>
module attributes {stable_mosaic.version = 11 : i64} {
  func.func @_critic_kernel(%arg0: i32, %arg1: memref<4x24xf32, #tpu.memory_space<vmem>>, %arg2: memref<4x8xf32, #tpu.memory_space<vmem>>, %arg3: memref<24x512xbf16, #tpu.memory_space<vmem>>, %arg4: memref<8x512xbf16, #tpu.memory_space<vmem>>, %arg5: memref<1x512xf32, #tpu.memory_space<vmem>>, %arg6: memref<512x256xbf16, #tpu.memory_space<vmem>>, %arg7: memref<1x256xf32, #tpu.memory_space<vmem>>, %arg8: memref<256x256xbf16, #tpu.memory_space<vmem>>, %arg9: memref<1x256xf32, #tpu.memory_space<vmem>>, %arg10: memref<1x256xf32, #tpu.memory_space<vmem>>, %arg11: memref<1x1xf32, #tpu.memory_space<vmem>>, %arg12: memref<1x4xf32, #tpu.memory_space<vmem>>) attributes {dimension_semantics = [#tpu.dimension_semantics<parallel>], iteration_bounds = array<i64: 1>, scalar_prefetch = 0 : i64, scratch_operands = 0 : i64, tpu.core_type = #tpu.core_type<tc>, window_params = [{transform_indices = @transform_0, window_bounds = array<i64: 4, 24>}, {transform_indices = @transform_1, window_bounds = array<i64: 4, 8>}, {pipeline_mode = #tpu.pipeline_mode<synchronous>, transform_indices = @transform_2, window_bounds = array<i64: 24, 512>}, {pipeline_mode = #tpu.pipeline_mode<synchronous>, transform_indices = @transform_3, window_bounds = array<i64: 8, 512>}, {pipeline_mode = #tpu.pipeline_mode<synchronous>, transform_indices = @transform_4, window_bounds = array<i64: 1, 512>}, {pipeline_mode = #tpu.pipeline_mode<synchronous>, transform_indices = @transform_5, window_bounds = array<i64: 512, 256>}, {pipeline_mode = #tpu.pipeline_mode<synchronous>, transform_indices = @transform_6, window_bounds = array<i64: 1, 256>}, {pipeline_mode = #tpu.pipeline_mode<synchronous>, transform_indices = @transform_7, window_bounds = array<i64: 256, 256>}, {pipeline_mode = #tpu.pipeline_mode<synchronous>, transform_indices = @transform_8, window_bounds = array<i64: 1, 256>}, {pipeline_mode = #tpu.pipeline_mode<synchronous>, transform_indices = @transform_9, window_bounds = array<i64: 1, 256>}, {pipeline_mode = #tpu.pipeline_mode<synchronous>, transform_indices = @transform_10, window_bounds = array<i64: 1, 1>}, {transform_indices = @transform_11, window_bounds = array<i64: 1, 4>}]} {
    %c0 = arith.constant 0 : index
    %c0_0 = arith.constant 0 : index
    %0 = vector.load %arg1[%c0, %c0_0] : memref<4x24xf32, #tpu.memory_space<vmem>>, vector<4x24xf32>
    %1 = arith.truncf %0 : vector<4x24xf32> to vector<4x24xbf16>
    %c0_1 = arith.constant 0 : index
    %c0_2 = arith.constant 0 : index
    %2 = vector.load %arg2[%c0_1, %c0_2] : memref<4x8xf32, #tpu.memory_space<vmem>>, vector<4x8xf32>
    %3 = arith.truncf %2 : vector<4x8xf32> to vector<4x8xbf16>
    %c0_3 = arith.constant 0 : index
    %c0_4 = arith.constant 0 : index
    %4 = vector.load %arg3[%c0_3, %c0_4] : memref<24x512xbf16, #tpu.memory_space<vmem>>, vector<24x512xbf16>
    %cst = arith.constant dense<0.000000e+00> : vector<4x512xf32>
    %5 = tpu.matmul %1, %4, %cst {dimension_numbers = #tpu.dot_dimension_numbers<[1], [0], [0], [1], [0, 0, 1, 1], [], []>} : vector<4x24xbf16>, vector<24x512xbf16>, vector<4x512xf32> -> vector<4x512xf32>
    %c0_5 = arith.constant 0 : index
    %c0_6 = arith.constant 0 : index
    %6 = vector.load %arg4[%c0_5, %c0_6] : memref<8x512xbf16, #tpu.memory_space<vmem>>, vector<8x512xbf16>
    %cst_7 = arith.constant dense<0.000000e+00> : vector<4x512xf32>
    %7 = tpu.matmul %3, %6, %cst_7 {dimension_numbers = #tpu.dot_dimension_numbers<[1], [0], [0], [1], [0, 0, 1, 1], [], []>} : vector<4x8xbf16>, vector<8x512xbf16>, vector<4x512xf32> -> vector<4x512xf32>
    %8 = arith.addf %5, %7 : vector<4x512xf32>
    %c0_8 = arith.constant 0 : index
    %c0_9 = arith.constant 0 : index
    %9 = vector.load %arg5[%c0_8, %c0_9] : memref<1x512xf32, #tpu.memory_space<vmem>>, vector<1x512xf32>
    %10 = vector.broadcast %9 : vector<1x512xf32> to vector<4x512xf32>
    %11 = arith.addf %8, %10 : vector<4x512xf32>
    %cst_10 = arith.constant 0.000000e+00 : f32
    %12 = vector.broadcast %cst_10 : f32 to vector<4x512xf32>
    %13 = arith.maximumf %11, %12 : vector<4x512xf32>
    %14 = arith.truncf %13 : vector<4x512xf32> to vector<4x512xbf16>
    %c0_11 = arith.constant 0 : index
    %c0_12 = arith.constant 0 : index
    %15 = vector.load %arg6[%c0_11, %c0_12] : memref<512x256xbf16, #tpu.memory_space<vmem>>, vector<512x256xbf16>
    %cst_13 = arith.constant dense<0.000000e+00> : vector<4x256xf32>
    %16 = tpu.matmul %14, %15, %cst_13 {dimension_numbers = #tpu.dot_dimension_numbers<[1], [0], [0], [1], [0, 0, 1, 1], [], []>} : vector<4x512xbf16>, vector<512x256xbf16>, vector<4x256xf32> -> vector<4x256xf32>
    %c0_14 = arith.constant 0 : index
    %c0_15 = arith.constant 0 : index
    %17 = vector.load %arg7[%c0_14, %c0_15] : memref<1x256xf32, #tpu.memory_space<vmem>>, vector<1x256xf32>
    %18 = vector.broadcast %17 : vector<1x256xf32> to vector<4x256xf32>
    %19 = arith.addf %16, %18 : vector<4x256xf32>
    %cst_16 = arith.constant 0.000000e+00 : f32
    %20 = vector.broadcast %cst_16 : f32 to vector<4x256xf32>
    %21 = arith.maximumf %19, %20 : vector<4x256xf32>
    %22 = arith.truncf %21 : vector<4x256xf32> to vector<4x256xbf16>
    %c0_17 = arith.constant 0 : index
    %c0_18 = arith.constant 0 : index
    %23 = vector.load %arg8[%c0_17, %c0_18] : memref<256x256xbf16, #tpu.memory_space<vmem>>, vector<256x256xbf16>
    %cst_19 = arith.constant dense<0.000000e+00> : vector<4x256xf32>
    %24 = tpu.matmul %22, %23, %cst_19 {dimension_numbers = #tpu.dot_dimension_numbers<[1], [0], [0], [1], [0, 0, 1, 1], [], []>} : vector<4x256xbf16>, vector<256x256xbf16>, vector<4x256xf32> -> vector<4x256xf32>
    %c0_20 = arith.constant 0 : index
    %c0_21 = arith.constant 0 : index
    %25 = vector.load %arg9[%c0_20, %c0_21] : memref<1x256xf32, #tpu.memory_space<vmem>>, vector<1x256xf32>
    %26 = vector.broadcast %25 : vector<1x256xf32> to vector<4x256xf32>
    %27 = arith.addf %24, %26 : vector<4x256xf32>
    %cst_22 = arith.constant 0.000000e+00 : f32
    %28 = vector.broadcast %cst_22 : f32 to vector<4x256xf32>
    %29 = arith.maximumf %27, %28 : vector<4x256xf32>
    %c0_23 = arith.constant 0 : index
    %c0_24 = arith.constant 0 : index
    %30 = vector.load %arg10[%c0_23, %c0_24] : memref<1x256xf32, #tpu.memory_space<vmem>>, vector<1x256xf32>
    %31 = vector.broadcast %30 : vector<1x256xf32> to vector<4x256xf32>
    %32 = arith.mulf %29, %31 : vector<4x256xf32>
    %cst_25 = arith.constant dense<0.000000e+00> : vector<4xf32>
    %33 = vector.multi_reduction <add>, %32, %cst_25 [1] : vector<4x256xf32> to vector<4xf32>
    %34 = vector.shape_cast %33 : vector<4xf32> to vector<1x4xf32>
    %c0_26 = arith.constant 0 : index
    %c0_27 = arith.constant 0 : index
    %35 = vector.load %arg11[%c0_26, %c0_27] : memref<1x1xf32, #tpu.memory_space<vmem>>, vector<1x1xf32>
    %36 = vector.broadcast %35 : vector<1x1xf32> to vector<1x4xf32>
    %37 = arith.addf %34, %36 : vector<1x4xf32>
    %c0_28 = arith.constant 0 : index
    %c0_29 = arith.constant 0 : index
    %38 = vector.load %arg12[%c0_28, %c0_29] : memref<1x4xf32, #tpu.memory_space<vmem>>, vector<1x4xf32>
    tpu.vector_store %arg12[%c0_28, %c0_29], %37 {strides = array<i32>} : memref<1x4xf32, #tpu.memory_space<vmem>>, vector<1x4xf32>,
    return
  }
  func.func @transform_0(%arg0: i32) -> (i32, i32) {
    %c0_i32 = arith.constant 0 : i32
    %c0_i32_0 = arith.constant 0 : i32
    return %arg0, %c0_i32 : i32, i32
  }
  func.func @transform_1(%arg0: i32) -> (i32, i32) {
    %c0_i32 = arith.constant 0 : i32
    %c0_i32_0 = arith.constant 0 : i32
    return %arg0, %c0_i32 : i32, i32
  }
  func.func @transform_2(%arg0: i32) -> (i32, i32) {
    %c0_i32 = arith.constant 0 : i32
    %c0_i32_0 = arith.constant 0 : i32
    %c0_i32_1 = arith.constant 0 : i32
    return %c0_i32, %c0_i32_0 : i32, i32
  }
  func.func @transform_3(%arg0: i32) -> (i32, i32) {
    %c0_i32 = arith.constant 0 : i32
    %c0_i32_0 = arith.constant 0 : i32
    %c0_i32_1 = arith.constant 0 : i32
    return %c0_i32, %c0_i32_0 : i32, i32
  }
  func.func @transform_4(%arg0: i32) -> (i32, i32) {
    %c0_i32 = arith.constant 0 : i32
    %c0_i32_0 = arith.constant 0 : i32
    %c0_i32_1 = arith.constant 0 : i32
    return %c0_i32, %c0_i32_0 : i32, i32
  }
  func.func @transform_5(%arg0: i32) -> (i32, i32) {
    %c0_i32 = arith.constant 0 : i32
    %c0_i32_0 = arith.constant 0 : i32
    %c0_i32_1 = arith.constant 0 : i32
    return %c0_i32, %c0_i32_0 : i32, i32
  }
  func.func @transform_6(%arg0: i32) -> (i32, i32) {
    %c0_i32 = arith.constant 0 : i32
    %c0_i32_0 = arith.constant 0 : i32
    %c0_i32_1 = arith.constant 0 : i32
    return %c0_i32, %c0_i32_0 : i32, i32
  }
  func.func @transform_7(%arg0: i32) -> (i32, i32) {
    %c0_i32 = arith.constant 0 : i32
    %c0_i32_0 = arith.constant 0 : i32
    %c0_i32_1 = arith.constant 0 : i32
    return %c0_i32, %c0_i32_0 : i32, i32
  }
  func.func @transform_8(%arg0: i32) -> (i32, i32) {
    %c0_i32 = arith.constant 0 : i32
    %c0_i32_0 = arith.constant 0 : i32
    %c0_i32_1 = arith.constant 0 : i32
    return %c0_i32, %c0_i32_0 : i32, i32
  }
  func.func @transform_9(%arg0: i32) -> (i32, i32) {
    %c0_i32 = arith.constant 0 : i32
    %c0_i32_0 = arith.constant 0 : i32
    %c0_i32_1 = arith.constant 0 : i32
    return %c0_i32, %c0_i32_0 : i32, i32
  }
  func.func @transform_10(%arg0: i32) -> (i32, i32) {
    %c0_i32 = arith.constant 0 : i32
    %c0_i32_0 = arith.constant 0 : i32
    %c0_i32_1 = arith.constant 0 : i32
    return %c0_i32, %c0_i32_0 : i32, i32
  }
  func.func @transform_11(%arg0: i32) -> (i32, i32) {
    %c0_i32 = arith.constant 0 : i32
    %c0_i32_0 = arith.constant 0 : i32
    return %arg0, %c0_i32 : i32, i32
  }
}

</mosaic_0001>

<bundles_post_ra>
// kernel: tpu_custom_call.1
= control target key start
LH: loop header
LB: loop body
LE: loop exit
PB: predicated region body
PF: predicated region fallthrough
CT: control target
= control target key end

     0   :  { %s1818_s0 = inlined_call_operand.hbm [shape: f32[4,24], index: 0, kind: input, shape index: {}]   ;;  %s1819_s1 = inlined_call_operand.vmem [shape: f32[4,8], index: 1, kind: input, shape index: {}]   ;;  %s1820_s2 = inlined_call_operand.hbm [shape: bf16[24,512], index: 2, kind: input, shape index: {}]   ;;  %s1821_s3 = inlined_call_operand.hbm [shape: bf16[8,512], index: 3, kind: input, shape index: {}]   ;;  %s1822_s4 = inlined_call_operand.vmem [shape: f32[1,512], index: 4, kind: input, shape index: {}]   ;;  %s1823_s5 = inlined_call_operand.hbm [shape: bf16[512,256], index: 5, kind: input, shape index: {}]   ;;  %s1824_s6 = inlined_call_operand.vmem [shape: f32[1,256], index: 6, kind: input, shape index: {}]   ;;  %s1825_s7 = inlined_call_operand.hbm [shape: bf16[256,256], index: 7, kind: input, shape index: {}]   ;;  %s1826_s8 = inlined_call_operand.vmem [shape: f32[1,256], index: 8, kind: input, shape index: {}]   ;;  %s1827_s9 = inlined_call_operand.vmem [shape: f32[1,256], index: 9, kind: input, shape index: {}]   ;;  %s1828_s10 = inlined_call_operand.<no memory space> [shape: f32[1,1], index: 10, kind: input, shape index: {}]   ;;  %s1829_s11 = inlined_call_operand.hbm [shape: f32[1,4], index: 11, kind: output, shape index: {}]  }
   0x1   :  { %v16_v0 = vstv %s1828_s10 }
   0x2   :  { %17 = vst [vmem:[#allocation2] sm:$0x1] %v16_v0 }
   0x3   :  { %18 = vsyncpa [#allocation4], 0 }
   0x4   :  { %19 = vsyncpa [#allocation7], 0 }
   0x5   :  { %20 = vsyncpa [#allocation10], 0 }
   0x6   :  { %21 = vsyncpa [#allocation5], 0  ;;  %s1607_s19 = smov [#allocation6]   ;;  %s1467_s23 = scalar_lea.hbm %s1820_s2, 768 }
   0x7   :  { %s39_s20 = sshll.u32 %s1607_s19, 4  ;;  %p1468_p0 = scmp.ne.s32.totalorder %s1820_s2, %s1467_s23  ;;  %s40_s20 = int_to_ptr.vmem [resolvable:$true] %s39_s20 }
   0x8   :  { %p1471_p1 = scmp.lt.u32.totalorder %s1467_s23, %s1820_s2 }
   0xa   :  { %p1473_p2 = pnand %p1471_p1, %p1468_p0 }
   0xc   :  { %1476 = shalt.err (!%p1473_p2)
}
   0xd   :  { %s1477_s10 = scalar_lea.vmem %s40_s20, 768  ;;  %p1482_p4 = scmp.lt.s32.totalorder %s40_s20, %s40_s20 }
   0xe   :  { %p1478_p3 = scmp.ne.s32.totalorder %s40_s20, %s1477_s10  ;;  %p1483_p5 = scmp.lt.s32.totalorder %s1477_s10, %s1477_s10 }
  0x10   :  { %p1484_p6 = por %p1483_p5, %p1482_p4 }
  0x12   :  { %p1485_p7 = pnand %p1484_p6, %p1478_p3 }
  0x14   :  { %1488 = shalt.err (!%p1485_p7)
}
  0x15   :  { %s1608_s28 = smov 256   ;;  %s1609_s29 = smov 16  }
  0x16   :  { %45 = dma.hbm_to_vmem [thread:$0]  %s1820_s2, 768, %s40_s20, [#allocation7], %s1608_s28, %s1608_s28, %s1609_s29  }
  0x17   :  { %s1610_s13 = smov [#allocation9]   ;;  %s1489_s17 = scalar_lea.hbm %s1823_s5, 8192 }
  0x18   :  { %s63_s14 = sshll.u32 %s1610_s13, 4  ;;  %p1490_p8 = scmp.ne.s32.totalorder %s1823_s5, %s1489_s17  ;;  %s64_s14 = int_to_ptr.vmem [resolvable:$true] %s63_s14 }
  0x19   :  { %p1493_p9 = scmp.lt.u32.totalorder %s1489_s17, %s1823_s5 }
  0x1b   :  { %p1495_p10 = pnand %p1493_p9, %p1490_p8 }
  0x1d   :  { %1498 = shalt.err (!%p1495_p10)
}
  0x1e   :  { %s1499_s23 = scalar_lea.vmem %s64_s14, 8192  ;;  %p1504_p12 = scmp.lt.s32.totalorder %s64_s14, %s64_s14 }
  0x1f   :  { %p1500_p11 = scmp.ne.s32.totalorder %s64_s14, %s1499_s23  ;;  %p1505_p13 = scmp.lt.s32.totalorder %s1499_s23, %s1499_s23 }
  0x21   :  { %p1506_p0 = por %p1505_p13, %p1504_p12 }
  0x23   :  { %p1507_p1 = pnand %p1506_p0, %p1500_p11 }
  0x25   :  { %1510 = shalt.err (!%p1507_p1)
}
  0x26   :  { %s1611_s2 = smov 128   ;;  %s1612_s20 = smov 8  }
  0x27   :  { %69 = dma.hbm_to_vmem [thread:$0]  %s1823_s5, 8192, %s64_s14, [#allocation10], %s1611_s2, %s1611_s2, %s1612_s20  }
  0x28   :  { %s1613_s26 = smov [#allocation3]   ;;  %s1614_s10 = smov [#allocation8]  }
  0x29   :  { %s28_s27 = sshll.u32 %s1613_s26, 4  ;;  %s52_s28 = sshll.u32 %s1614_s10, 4  ;;  %s29_s27 = int_to_ptr.vmem [resolvable:$true] %s28_s27  ;;  %s53_s28 = int_to_ptr.vmem [resolvable:$true] %s52_s28 }
  0x2a   :  { %s1511_s12 = scalar_lea.hbm %s1818_s0, 64 }
  0x2b   :  { %p1512_p2 = scmp.ne.s32.totalorder %s1818_s0, %s1511_s12  ;;  %p1515_p3 = scmp.lt.u32.totalorder %s1511_s12, %s1818_s0 }
  0x2d   :  { %p1517_p4 = pnand %p1515_p3, %p1512_p2 }
  0x2f   :  { %1520 = shalt.err (!%p1517_p4)
}
  0x30   :  { %s1521_s5 = scalar_lea.vmem %s29_s27, 64  ;;  %p1526_p6 = scmp.lt.s32.totalorder %s29_s27, %s29_s27 }
  0x31   :  { %p1522_p5 = scmp.ne.s32.totalorder %s29_s27, %s1521_s5  ;;  %p1527_p7 = scmp.lt.s32.totalorder %s1521_s5, %s1521_s5 }
  0x33   :  { %p1528_p8 = por %p1527_p7, %p1526_p6 }
  0x35   :  { %p1529_p9 = pnand %p1528_p8, %p1522_p5 }
  0x37   :  { %1532 = shalt.err (!%p1529_p9)
}
  0x38   :  { %31 = dma.hbm_to_vmem [thread:$0]  %s1818_s0, 64, %s29_s27, [#allocation4]  }
  0x39   :  { %s1533_s22 = scalar_lea.hbm %s1821_s3, 256 }
  0x3a   :  { %p1534_p10 = scmp.ne.s32.totalorder %s1821_s3, %s1533_s22  ;;  %p1537_p11 = scmp.lt.u32.totalorder %s1533_s22, %s1821_s3 }
  0x3c   :  { %p1539_p12 = pnand %p1537_p11, %p1534_p10 }
  0x3e   :  { %1542 = shalt.err (!%p1539_p12)
}
  0x3f   :  { %s1543_s10 = scalar_lea.vmem %s53_s28, 256  ;;  %p1548_p0 = scmp.lt.s32.totalorder %s53_s28, %s53_s28 }
  0x40   :  { %p1544_p13 = scmp.ne.s32.totalorder %s53_s28, %s1543_s10  ;;  %p1549_p1 = scmp.lt.s32.totalorder %s1543_s10, %s1543_s10 }
  0x42   :  { %p1550_p2 = por %p1549_p1, %p1548_p0 }
  0x44   :  { %p1551_p3 = pnand %p1550_p2, %p1544_p13 }
  0x46   :  { %1554 = shalt.err (!%p1551_p3)
}
  0x47   :  { %55 = dma.hbm_to_vmem [thread:$0]  %s1821_s3, 256, %s53_s28, [#allocation7]  }
  0x48   :  { %s1615_s29 = smov [#allocation11]   ;;  %s1555_s15 = scalar_lea.hbm %s1825_s7, 4096 }
  0x49   :  { %s77_s30 = sshll.u32 %s1615_s29, 4  ;;  %p1556_p4 = scmp.ne.s32.totalorder %s1825_s7, %s1555_s15  ;;  %s78_s30 = int_to_ptr.vmem [resolvable:$true] %s77_s30 }
  0x4a   :  { %p1559_p5 = scmp.lt.u32.totalorder %s1555_s15, %s1825_s7 }
  0x4c   :  { %p1561_p6 = pnand %p1559_p5, %p1556_p4 }
  0x4e   :  { %1564 = shalt.err (!%p1561_p6)
}
  0x4f   :  { %s1565_s18 = scalar_lea.vmem %s78_s30, 4096  ;;  %p1570_p8 = scmp.lt.s32.totalorder %s78_s30, %s78_s30 }
  0x50   :  { %p1566_p7 = scmp.ne.s32.totalorder %s78_s30, %s1565_s18  ;;  %p1571_p9 = scmp.lt.s32.totalorder %s1565_s18, %s1565_s18 }
  0x52   :  { %p1572_p10 = por %p1571_p9, %p1570_p8 }
  0x54   :  { %p1573_p11 = pnand %p1572_p10, %p1566_p7 }
  0x56   :  { %1576 = shalt.err (!%p1573_p11)
}
  0x57   :  { %83 = dma.hbm_to_vmem [thread:$0]  %s1825_s7, 4096, %s78_s30, [#allocation10], %s1611_s2, %s1611_s2, %s1612_s20  }
  0x58   :  { %1599 = dma.done.wait [#allocation4], 64  }
  0x59   :  { %1600 = vsyncadd [#allocation4], 4294967232 }
  0x5a   :  { %1601 = dma.done.wait [#allocation7], 1024  }
  0x5b   :  { %1602 = vsyncadd [#allocation7], 4294966272 }
  0x5c   :  { %1603 = dma.done.wait [#allocation10], 12288  }
  0x5d   :  { %1604 = vsyncadd [#allocation10], 4294955008  ;;  %v1616_v1 = vmov 0   ;;  %v116_v2 = vld [vmem:[#allocation8] sm:$0xff]  ;;  %vm132_vm0 = vcmask 1043456   ;;  %v117_v4 = vld [vmem:[#allocation8 + $0x8] sm:$0xff] }
  0x5e   :  { %177 = vmatprep.mubr.bf16.mxu1 %v1616_v1  ;;  %1308 = vset.pattern.permute.xlu0 %v1616_v1  ;;  %v108_v3 = vld [vmem:[%s1819_s1] sm:$0xf]  ;;  %v1176_v5 = vcombine.high %v116_v2, %v116_v2  ;;  %v1175_v6 = vcombine.low %v116_v2, %v116_v2  ;;  %v1178_v7 = vcombine.high %v117_v4, %v117_v4  ;;  %vm128_vm1 = vcmask 64512   ;;  %v1315_v11 = vld [vmem:[#allocation6 + $0x4] ss:$16 sps:$4 sm:$0xff]   ;;  %v115_v26 = vld [vmem:[#allocation6 + $0x28] sm:$0xff] }
  0x5f   :  { %v1177_v8 = vcombine.low %v117_v4, %v117_v4  ;;  %v109_v10 = vpack.c.bf16 %v108_v3, %v108_v3  ;;  %v1323_v13 = vld [vmem:[#allocation9 + $0x4] ss:$8 sps:$4 sm:$0xff]   ;;  %v1325_v14 = vld [vmem:[#allocation9] ss:$8 sps:$4 sm:$0xff]   ;;  %v1326_v15 = vld [vmem:[#allocation9 + $0x14] ss:$8 sps:$4 sm:$0xff]   ;;  %v1190_v34 = vcombine.high %v115_v26, %v115_v26  ;;  %v1189_v35 = vcombine.low %v115_v26, %v115_v26 }
  0x60   :  { %1179 = vmatprep.subr.msk.bf16.mxu1 %vm132_vm0, %v1176_v5  ;;  %v134_v9 = vsel %vm132_vm0, %v1175_v6, 0  ;;  %785 = vmatprep.subr.bf16.mxu0 %v1323_v13  ;;  %v114_v16 = vld [vmem:[#allocation6 + $0x20] sm:$0xff]  ;;  %v1328_v17 = vld [vmem:[#allocation9 + $0x10] ss:$8 sps:$4 sm:$0xff]   ;;  %v1332_v23 = vld [vmem:[#allocation9 + $0x34] ss:$8 sps:$4 sm:$0xff]  }
  0x61   :  { %146 = vmatpush1.bf16.msra.mxu1 %v134_v9  ;;  %v140_v12 = vsel %vm132_vm0, %v1177_v8, 0  ;;  %786 = vmatpush1.bf16.msra.mxu0 %v1325_v14  ;;  %v1329_v18 = vld [vmem:[#allocation9 + $0x24] ss:$8 sps:$4 sm:$0xff]   ;;  %v1313_v19 = vld [vmem:[#allocation6] ss:$16 sps:$4 sm:$0xff]   ;;  %v1188_v20 = vcombine.high %v114_v16, %v114_v16  ;;  %v1187_v21 = vcombine.low %v114_v16, %v114_v16  ;;  %vm257_vm2 = vcmask 195584  }
  0x62   :  { %1181 = vmatprep.subr.msk.bf16.mxu1 %vm132_vm0, %v1178_v7  ;;  %787 = vmatprep.subr.bf16.mxu0 %v1326_v15  ;;  %v1331_v22 = vld [vmem:[#allocation9 + $0x20] ss:$8 sps:$4 sm:$0xff]   ;;  %v106_v24 = vld [vmem:[#allocation3] sm:$0xf]  ;;  %v1334_v28 = vld [vmem:[#allocation9 + $0x30] ss:$8 sps:$4 sm:$0xff]  }
  0x63   :  { %v1320_v25 = vld [vmem:[#allocation6 + $0xc] ss:$16 sps:$4 sm:$0xff]   ;;  %v262_v27 = vsel %vm132_vm0, %v1187_v21, 0  ;;  %v1318_v30 = vld [vmem:[#allocation6 + $0x8] ss:$16 sps:$4 sm:$0xff]   ;;  %v107_v31 = vpack.c.bf16 %v106_v24, %v106_v24  ;;  %v268_v38 = vsel %vm132_vm0, %v1189_v35, 0  ;;  %v357_v21 = vlaneseq }
  0x64   :  { %1180 = vmatmul.mubr.msk.bf16.vlgmr.msra.gmra.mrb[0].mxu1 %vm128_vm1, %v109_v10  ;;  %v1335_v29 = vld [vmem:[#allocation9 + $0x44] ss:$8 sps:$4 sm:$0xff]   ;;  %v1337_v32 = vld [vmem:[#allocation9 + $0x40] ss:$8 sps:$4 sm:$0xff]   ;;  %v1338_v33 = vld [vmem:[#allocation9 + $0x54] ss:$8 sps:$4 sm:$0xff]  }
  0x65   :  { %187 = vmatpush1.bf16.msra.mxu1 %v140_v12  ;;  %218 = vmatprep.mubr.bf16.mxu1 %v1616_v1  ;;  %v1340_v36 = vld [vmem:[#allocation9 + $0x50] ss:$8 sps:$4 sm:$0xff]   ;;  %v1341_v37 = vld [vmem:[#allocation9 + $0x64] ss:$8 sps:$4 sm:$0xff]   ;;  %v1343_v39 = vld [vmem:[#allocation9 + $0x60] ss:$8 sps:$4 sm:$0xff]  }
  0x66   :  { %273 = vmatprep.subr.bf16.mxu1 %v1315_v11  ;;  %788 = vmatpush1.bf16.msra.mxu0 %v1328_v17  ;;  %v1344_v40 = vld [vmem:[#allocation9 + $0x74] ss:$8 sps:$4 sm:$0xff]   ;;  %v1346_v41 = vld [vmem:[#allocation9 + $0x70] ss:$8 sps:$4 sm:$0xff]   ;;  %v1347_v42 = vld [vmem:[#allocation9 + $0x84] ss:$8 sps:$4 sm:$0xff]  }
  0x67   :  { %789 = vmatprep.subr.bf16.mxu0 %v1329_v18  ;;  %v1349_v43 = vld [vmem:[#allocation9 + $0x80] ss:$8 sps:$4 sm:$0xff]   ;;  %v1350_v44 = vld [vmem:[#allocation9 + $0x94] ss:$8 sps:$4 sm:$0xff]   ;;  %v1352_v45 = vld [vmem:[#allocation9 + $0x90] ss:$8 sps:$4 sm:$0xff]  }
  0x68   :  { %v1353_v46 = vld [vmem:[#allocation9 + $0xa4] ss:$8 sps:$4 sm:$0xff]   ;;  %v1355_v47 = vld [vmem:[#allocation9 + $0xa0] ss:$8 sps:$4 sm:$0xff]   ;;  %v1356_v48 = vld [vmem:[#allocation9 + $0xb4] ss:$8 sps:$4 sm:$0xff]  }
  0x69   :  { %v1358_v49 = vld [vmem:[#allocation9 + $0xb0] ss:$8 sps:$4 sm:$0xff]   ;;  %v1359_v50 = vld [vmem:[#allocation9 + $0xc4] ss:$8 sps:$4 sm:$0xff]   ;;  %v1361_v51 = vld [vmem:[#allocation9 + $0xc0] ss:$8 sps:$4 sm:$0xff]  }
  0x6a   :  { %790 = vmatpush1.bf16.msra.mxu0 %v1331_v22  ;;  %v1362_v52 = vld [vmem:[#allocation9 + $0xd4] ss:$8 sps:$4 sm:$0xff]   ;;  %v1364_v53 = vld [vmem:[#allocation9 + $0xd0] ss:$8 sps:$4 sm:$0xff]   ;;  %v1365_v54 = vld [vmem:[#allocation9 + $0xe4] ss:$8 sps:$4 sm:$0xff]  }
  0x6b   :  { %791 = vmatprep.subr.bf16.mxu0 %v1332_v23  ;;  %v1367_v55 = vld [vmem:[#allocation9 + $0xe0] ss:$8 sps:$4 sm:$0xff]   ;;  %v1368_v56 = vld [vmem:[#allocation9 + $0xf4] ss:$8 sps:$4 sm:$0xff]   ;;  %v1370_v57 = vld [vmem:[#allocation9 + $0xf0] ss:$8 sps:$4 sm:$0xff]  }
  0x6c   :  { %1182 = vmatmul.mubr.msk.bf16.vlgmr.msra.gmra.mrb[4].mxu1 %vm128_vm1, %v109_v10  ;;  %v1373_v58 = vld [vmem:[#allocation9 + $0x104] ss:$8 sps:$4 sm:$0xff]   ;;  %v1419_v59 = vld [vmem:[#allocation11] ss:$8 sps:$4 sm:$0xff]   ;;  %v1424_v61 = vld [vmem:[#allocation11 + $0x14] ss:$8 sps:$4 sm:$0xff]  }
  0x6d   :  { %274 = vmatpush1.bf16.msra.mxu1 %v1313_v19  ;;  %305 = vmatprep.mubr.bf16.mxu1 %v1616_v1  ;;  %v1421_v60 = vld [vmem:[#allocation11 + $0x4] ss:$8 sps:$4 sm:$0xff]   ;;  %v1422_v62 = vld [vmem:[#allocation11 + $0x10] ss:$8 sps:$4 sm:$0xff]   ;;  %v1425_v0 = vld [vmem:[#allocation11 + $0x20] ss:$8 sps:$4 sm:$0xff]  }
  0x6e   :  { %1191 = vmatprep.subr.msk.bf16.mxu1 %vm132_vm0, %v1188_v20  ;;  %792 = vmatpush1.bf16.msra.mxu0 %v1334_v28  ;;  %v1427_v63 = vld [vmem:[#allocation11 + $0x24] ss:$8 sps:$4 sm:$0xff]   ;;  %v1428_v2 = vld [vmem:[#allocation11 + $0x30] ss:$8 sps:$4 sm:$0xff]   ;;  %v1431_v4 = vld [vmem:[#allocation11 + $0x40] ss:$8 sps:$4 sm:$0xff]  }
  0x6f   :  { %793 = vmatprep.subr.bf16.mxu0 %v1335_v29  ;;  %v1433_v3 = vld [vmem:[#allocation11 + $0x44] ss:$8 sps:$4 sm:$0xff]   ;;  %v1436_v5 = vld [vmem:[#allocation11 + $0x54] ss:$8 sps:$4 sm:$0xff]   ;;  %v1434_v6 = vld [vmem:[#allocation11 + $0x50] ss:$8 sps:$4 sm:$0xff]  }
  0x70   :  { %v1439_v7 = vld [vmem:[#allocation11 + $0x64] ss:$8 sps:$4 sm:$0xff]   ;;  %v1437_v8 = vld [vmem:[#allocation11 + $0x60] ss:$8 sps:$4 sm:$0xff]   ;;  %v1442_v9 = vld [vmem:[#allocation11 + $0x74] ss:$8 sps:$4 sm:$0xff]  }
  0x71   :  { %276 = vmatpush1.bf16.msra.mxu1 %v262_v27  ;;  %v1440_v10 = vld [vmem:[#allocation11 + $0x70] ss:$8 sps:$4 sm:$0xff]   ;;  %v1445_v11 = vld [vmem:[#allocation11 + $0x84] ss:$8 sps:$4 sm:$0xff]   ;;  %v1443_v12 = vld [vmem:[#allocation11 + $0x80] ss:$8 sps:$4 sm:$0xff]  }
  0x72   :  { %314 = vmatprep.subr.bf16.mxu1 %v1320_v25  ;;  %794 = vmatpush1.bf16.msra.mxu0 %v1337_v32  ;;  %v1448_v13 = vld [vmem:[#allocation11 + $0x94] ss:$8 sps:$4 sm:$0xff]   ;;  %v1446_v14 = vld [vmem:[#allocation11 + $0x90] ss:$8 sps:$4 sm:$0xff]   ;;  %v1451_v15 = vld [vmem:[#allocation11 + $0xa4] ss:$8 sps:$4 sm:$0xff]  }
  0x73   :  { %795 = vmatprep.subr.bf16.mxu0 %v1338_v33  ;;  %v1449_v19 = vld [vmem:[#allocation11 + $0xa0] ss:$8 sps:$4 sm:$0xff]   ;;  %v1454_v22 = vld [vmem:[#allocation11 + $0xb4] ss:$8 sps:$4 sm:$0xff]   ;;  %v1452_v23 = vld [vmem:[#allocation11 + $0xb0] ss:$8 sps:$4 sm:$0xff]  }
  0x74   :  { %1192 = vmatmul.mubr.msk.bf16.vlgmr.msra.gmra.mrb[8].mxu1 %vm257_vm2, %v107_v31  ;;  %v1768_v24 = vshrl.u32 %v357_v21, 7  ;;  %v1457_v25 = vld [vmem:[#allocation11 + $0xc4] ss:$8 sps:$4 sm:$0xff]   ;;  %v1455_v29 = vld [vmem:[#allocation11 + $0xc0] ss:$8 sps:$4 sm:$0xff]   ;;  %vm1156_vm3 = vcmask 24576  }
  0x75   :  { %315 = vmatpush1.bf16.msra.mxu1 %v1318_v30  ;;  %346 = vmatprep.mubr.bf16.mxu1 %v1616_v1  ;;  %v1430_v1 = vld [vmem:[#allocation11 + $0x34] ss:$8 sps:$4 sm:$0xff]   ;;  %v1458_v35 = vld [vmem:[#allocation11 + $0xd0] ss:$8 sps:$4 sm:$0xff]  }
  0x76   :  { %1193 = vmatprep.subr.msk.bf16.mxu1 %vm132_vm0, %v1190_v34  ;;  %796 = vmatpush1.bf16.msra.mxu0 %v1340_v36  ;;  %v1460_v32 = vld [vmem:[#allocation11 + $0xd4] ss:$8 sps:$4 sm:$0xff]   ;;  %v1777_v34 = vsub.s32 1, %v1768_v24 }
  0x77   :  { %797 = vmatprep.subr.bf16.mxu0 %v1341_v37  ;;  %v355_v33 = vld [vmem:[%s1822_s4] sm:$0xf] }
  0x79   :  { %317 = vmatpush1.bf16.msra.mxu1 %v268_v38  ;;  %v364_v38 = vrot.slane %v355_v33, %v1777_v34 }
  0x7a   :  { %798 = vmatpush1.bf16.msra.mxu0 %v1343_v39  ;;  %1075 = vmatprep.subr.bf16.mxu1 %v1421_v60 }
  0x7b   :  { %799 = vmatprep.subr.bf16.mxu0 %v1344_v40 }
  0x7c   :  { %1194 = vmatmul.mubr.msk.bf16.vlgmr.msra.gmra.mrb[12].mxu1 %vm257_vm2, %v107_v31  ;;  %v1771_v31 = vsub.s32 0, %v1768_v24 }
  0x7d   :  { %1076 = vmatpush1.bf16.msra.mxu1 %v1419_v59 }
  0x7e   :  { %800 = vmatpush1.bf16.msra.mxu0 %v1346_v41  ;;  %1077 = vmatprep.subr.bf16.mxu1 %v1424_v61  ;;  %v360_v36 = vrot.slane %v355_v33, %v1771_v31 }
  0x7f   :  { %801 = vmatprep.subr.bf16.mxu0 %v1347_v42 }
  0x81   :  { %1078 = vmatpush1.bf16.msra.mxu1 %v1422_v62 }
  0x82   :  { %802 = vmatpush1.bf16.msra.mxu0 %v1349_v43  ;;  %1079 = vmatprep.subr.bf16.mxu1 %v1427_v63 }
  0x83   :  { %803 = vmatprep.subr.bf16.mxu0 %v1350_v44 }
  0x85   :  { %1080 = vmatpush1.bf16.msra.mxu1 %v1425_v0  ;;  %v1374_v0 = vld [vmem:[#allocation9 + $0x110] ss:$8 sps:$4 sm:$0xff]  }
  0x86   :  { %804 = vmatpush1.bf16.msra.mxu0 %v1352_v45  ;;  %1081 = vmatprep.subr.bf16.mxu1 %v1430_v1  ;;  %v367_v45 = vsub.s32 2, %v1768_v24  ;;  %v1379_v1 = vld [vmem:[#allocation9 + $0x124] ss:$8 sps:$4 sm:$0xff]  }
  0x87   :  { %805 = vmatprep.subr.bf16.mxu0 %v1353_v46  ;;  %v371_v46 = vsub.s32 3, %v1768_v24 }
  0x89   :  { %1082 = vmatpush1.bf16.msra.mxu1 %v1428_v2 }
  0x8a   :  { %806 = vmatpush1.bf16.msra.mxu0 %v1355_v47  ;;  %1083 = vmatprep.subr.bf16.mxu1 %v1433_v3 }
  0x8b   :  { %807 = vmatprep.subr.bf16.mxu0 %v1356_v48 }
  0x8d   :  { %1084 = vmatpush1.bf16.msra.mxu1 %v1431_v4  ;;  %v1377_v4 = vld [vmem:[#allocation9 + $0x120] ss:$8 sps:$4 sm:$0xff]  }
  0x8e   :  { %808 = vmatpush1.bf16.msra.mxu0 %v1358_v49  ;;  %1085 = vmatprep.subr.bf16.mxu1 %v1436_v5  ;;  %v1382_v5 = vld [vmem:[#allocation9 + $0x134] ss:$8 sps:$4 sm:$0xff]  }
  0x8f   :  { %809 = vmatprep.subr.bf16.mxu0 %v1359_v50  ;;  %v368_v50 = vrot.slane %v355_v33, %v367_v45 }
  0x91   :  { %1086 = vmatpush1.bf16.msra.mxu1 %v1434_v6  ;;  %v1380_v6 = vld [vmem:[#allocation9 + $0x130] ss:$8 sps:$4 sm:$0xff]  }
  0x92   :  { %810 = vmatpush1.bf16.msra.mxu0 %v1361_v51  ;;  %1087 = vmatprep.subr.bf16.mxu1 %v1439_v7  ;;  %v1385_v7 = vld [vmem:[#allocation9 + $0x144] ss:$8 sps:$4 sm:$0xff]  }
  0x93   :  { %811 = vmatprep.subr.bf16.mxu0 %v1362_v52  ;;  %v372_v52 = vrot.slane %v355_v33, %v371_v46  ;;  %v1416_v33 = vld [vmem:[#allocation9 + $0x1f0] ss:$8 sps:$4 sm:$0xff]  }
  0x95   :  { %1088 = vmatpush1.bf16.msra.mxu1 %v1437_v8  ;;  %v1383_v8 = vld [vmem:[#allocation9 + $0x140] ss:$8 sps:$4 sm:$0xff]  }
  0x96   :  { %812 = vmatpush1.bf16.msra.mxu0 %v1364_v53  ;;  %1089 = vmatprep.subr.bf16.mxu1 %v1442_v9  ;;  %v1388_v9 = vld [vmem:[#allocation9 + $0x154] ss:$8 sps:$4 sm:$0xff]  }
  0x97   :  { %813 = vmatprep.subr.bf16.mxu0 %v1365_v54  ;;  %v1371_v54 = vld [vmem:[#allocation9 + $0x100] ss:$8 sps:$4 sm:$0xff]  }
  0x99   :  { %1090 = vmatpush1.bf16.msra.mxu1 %v1440_v10  ;;  %v1386_v10 = vld [vmem:[#allocation9 + $0x150] ss:$8 sps:$4 sm:$0xff]  }
  0x9a   :  { %814 = vmatpush1.bf16.msra.mxu0 %v1367_v55  ;;  %1091 = vmatprep.subr.bf16.mxu1 %v1445_v11  ;;  %v1391_v11 = vld [vmem:[#allocation9 + $0x164] ss:$8 sps:$4 sm:$0xff]  }
  0x9b   :  { %815 = vmatprep.subr.bf16.mxu0 %v1368_v56 }
  0x9d   :  { %1092 = vmatpush1.bf16.msra.mxu1 %v1443_v12  ;;  %v1389_v12 = vld [vmem:[#allocation9 + $0x160] ss:$8 sps:$4 sm:$0xff]  }
  0x9e   :  { %816 = vmatpush1.bf16.msra.mxu0 %v1370_v57  ;;  %1093 = vmatprep.subr.bf16.mxu1 %v1448_v13  ;;  %v1394_v13 = vld [vmem:[#allocation9 + $0x174] ss:$8 sps:$4 sm:$0xff]  }
  0x9f   :  { %826 = vmatprep.subr.bf16.mxu0 %v1373_v58  ;;  %v1376_v58 = vld [vmem:[#allocation9 + $0x114] ss:$8 sps:$4 sm:$0xff]  }
  0xa1   :  { %1094 = vmatpush1.bf16.msra.mxu1 %v1446_v14  ;;  %v1392_v14 = vld [vmem:[#allocation9 + $0x170] ss:$8 sps:$4 sm:$0xff]  }
  0xa2   :  { %1095 = vmatprep.subr.bf16.mxu1 %v1451_v15  ;;  %v1397_v15 = vld [vmem:[#allocation9 + $0x184] ss:$8 sps:$4 sm:$0xff]  }
  0xa5   :  { %1096 = vmatpush1.bf16.msra.mxu1 %v1449_v19  ;;  %v1403_v19 = vld [vmem:[#allocation9 + $0x1a4] ss:$8 sps:$4 sm:$0xff]  }
  0xa6   :  { %1097 = vmatprep.subr.bf16.mxu1 %v1454_v22  ;;  %v1406_v22 = vld [vmem:[#allocation9 + $0x1b4] ss:$8 sps:$4 sm:$0xff]  }
  0xa9   :  { %1098 = vmatpush1.bf16.msra.mxu1 %v1452_v23  ;;  %v1404_v23 = vld [vmem:[#allocation9 + $0x1b0] ss:$8 sps:$4 sm:$0xff]  }
  0xaa   :  { %1099 = vmatprep.subr.bf16.mxu1 %v1457_v25  ;;  %v1409_v25 = vld [vmem:[#allocation9 + $0x1c4] ss:$8 sps:$4 sm:$0xff]  }
  0xad   :  { %1100 = vmatpush1.bf16.msra.mxu1 %v1455_v29  ;;  %v1415_v29 = vld [vmem:[#allocation9 + $0x1e4] ss:$8 sps:$4 sm:$0xff]  }
  0xae   :  { %1101 = vmatprep.subr.bf16.mxu1 %v1460_v32  ;;  %v1418_v32 = vld [vmem:[#allocation9 + $0x1f4] ss:$8 sps:$4 sm:$0xff]  }
  0xb1   :  { %1102 = vmatpush1.bf16.msra.mxu1 %v1458_v35 }
 0x137   :  { %v179_v16 = vpop.f32.mrb[0].mxu1 }
 0x138   :  { %v181_v17 = vpop.f32.mrb[1].mxu1 }
 0x139   :  { %v183_v18 = vpop.f32.mrb[2].mxu1 }
 0x13a   :  { %v184_v20 = vpop.f32.mrb[3].mxu1  ;;  %v1398_v18 = vld [vmem:[#allocation9 + $0x190] ss:$8 sps:$4 sm:$0xff]  }
 0x13b   :  { %v1401_v20 = vld [vmem:[#allocation9 + $0x1a0] ss:$8 sps:$4 sm:$0xff]  }
 0x13f   :  { %v220_v26 = vpop.f32.mrb[4].mxu1 }
 0x140   :  { %v222_v27 = vpop.f32.mrb[5].mxu1 }
 0x141   :  { %v224_v28 = vpop.f32.mrb[6].mxu1 }
 0x142   :  { %v225_v30 = vpop.f32.mrb[7].mxu1  ;;  %v1410_v28 = vld [vmem:[#allocation9 + $0x1d0] ss:$8 sps:$4 sm:$0xff]  }
 0x143   :  { %v1413_v30 = vld [vmem:[#allocation9 + $0x1e0] ss:$8 sps:$4 sm:$0xff]  }
 0x147   :  { %v307_v37 = vpop.f32.mrb[8].mxu1 }
 0x148   :  { %v308_v39 = vadd.f32 %v307_v37, %v179_v16  ;;  %v309_v40 = vpop.f32.mrb[9].mxu1  ;;  %v1395_v16 = vld [vmem:[#allocation9 + $0x180] ss:$8 sps:$4 sm:$0xff]   ;;  %v1463_v37 = vld [vmem:[#allocation11 + $0xe4] ss:$8 sps:$4 sm:$0xff]  }
 0x149   :  { %v310_v41 = vadd.f32 %v309_v40, %v181_v17  ;;  %v311_v42 = vpop.f32.mrb[10].mxu1  ;;  %v1400_v17 = vld [vmem:[#allocation9 + $0x194] ss:$8 sps:$4 sm:$0xff]   ;;  %1103 = vmatprep.subr.bf16.mxu1 %v1463_v37  ;;  %v1464_v40 = vld [vmem:[#allocation11 + $0xf0] ss:$8 sps:$4 sm:$0xff]  }
 0x14a   :  { %v377_v43 = vadd.f32 %v360_v36, %v308_v39  ;;  %v312_v44 = vpop.f32.mrb[11].mxu1  ;;  %v1466_v39 = vld [vmem:[#allocation11 + $0xf4] ss:$8 sps:$4 sm:$0xff]  }
 0x14b   :  { %v378_v47 = vadd.f32 %v364_v38, %v310_v41  ;;  %v1461_v38 = vld [vmem:[#allocation11 + $0xe0] ss:$8 sps:$4 sm:$0xff]   ;;  %v453_v41 = vld [vmem:[%s1824_s6] sm:$0x3] }
 0x14c   :  { %v381_v48 = vmax.f32 %v377_v43, 0.0  ;;  %1104 = vmatpush1.bf16.msra.mxu1 %v1461_v38  ;;  %v458_v42 = vrot.slane %v453_v41, %v1771_v31  ;;  %v462_v43 = vrot.slane %v453_v41, %v1777_v34 }
 0x14d   :  { %v382_v49 = vmax.f32 %v378_v47, 0.0  ;;  %1105 = vmatprep.subr.bf16.mxu1 %v1466_v39 }
 0x14e   :  { %v385_v55 = vpack.c.bf16 %v381_v48, %v381_v48 }
 0x14f   :  { %v348_v51 = vpop.f32.mrb[12].mxu1  ;;  %v386_v53 = vpack.c.bf16 %v382_v49, %v382_v49 }
 0x150   :  { %v349_v56 = vadd.f32 %v348_v51, %v220_v26  ;;  %v350_v57 = vpop.f32.mrb[13].mxu1  ;;  %v1407_v26 = vld [vmem:[#allocation9 + $0x1c0] ss:$8 sps:$4 sm:$0xff]   ;;  %1106 = vmatpush1.bf16.msra.mxu1 %v1464_v40 }
 0x151   :  { %v351_v59 = vadd.f32 %v350_v57, %v222_v27  ;;  %817 = vmatprep.mubr.bf16.mxu0 %v386_v53  ;;  %v352_v60 = vpop.f32.mrb[14].mxu1  ;;  %v1412_v27 = vld [vmem:[#allocation9 + $0x1d4] ss:$8 sps:$4 sm:$0xff]  }
 0x152   :  { %v1783_v61 = vadd.f32 %v368_v50, %v349_v56  ;;  %818 = vmatmul.mubr.bf16.vlgmr.msra.gmra.mrb[0].mxu0 %v385_v55  ;;  %v353_v62 = vpop.f32.mrb[15].mxu1  ;;  %v1118_v57 = vld [vmem:[%s1827_s9] sm:$0x3] }
 0x153   :  { %v380_v63 = vadd.f32 %v372_v52, %v351_v59  ;;  %827 = vmatpush1.bf16.msra.mxu0 %v1371_v54  ;;  %v903_v54 = vld [vmem:[%s1826_s8] sm:$0x3]  ;;  %s1617_s8 = smov [#allocation12]  }
 0x154   :  { %828 = vmatprep.subr.bf16.mxu0 %v1376_v58  ;;  %v383_v35 = vmax.f32 %v1783_v61, 0.0  ;;  %v908_v55 = vrot.slane %v903_v54, %v1771_v31  ;;  %v912_v56 = vrot.slane %v903_v54, %v1777_v34  ;;  %v1123_v61 = vrot.slane %v1118_v57, %v1771_v31  ;;  %s1164_s9 = sshll.u32 %s1617_s8, 4  ;;  %s1165_s9 = int_to_ptr.vmem [resolvable:$true] %s1164_s9 }
 0x155   :  { %v384_v2 = vmax.f32 %v380_v63, 0.0  ;;  %s1577_s24 = scalar_lea.vmem %s1165_s9, 16  ;;  %s1581_s25 = scalar_lea.vmem %s1165_s9, 32 }
 0x156   :  { %v387_v36 = vpack.c.bf16 %v383_v35, %v383_v35  ;;  %p1578_p12 = scmp.ne.s32.totalorder %s1165_s9, %s1577_s24  ;;  %p1582_p13 = scmp.lt.s32.totalorder %s1165_s9, %s1165_s9 }
 0x157   :  { %v388_v3 = vpack.c.bf16 %v384_v2, %v384_v2  ;;  %829 = vmatpush1.bf16.msra.mxu0 %v1374_v0  ;;  %v1127_v0 = vrot.slane %v1118_v57, %v1777_v34  ;;  %p1583_p0 = scmp.lt.s32.totalorder %s1581_s25, %s1577_s24 }
 0x158   :  { %830 = vmatprep.subr.bf16.mxu0 %v1379_v1 }
 0x159   :  { %858 = vmatprep.mubr.bf16.mxu0 %v388_v3  ;;  %p1584_p1 = por %p1583_p0, %p1582_p13 }
 0x15b   :  { %831 = vmatpush1.bf16.msra.mxu0 %v1377_v4  ;;  %p1585_p2 = pnand %p1584_p1, %p1578_p12 }
 0x15c   :  { %832 = vmatprep.subr.bf16.mxu0 %v1382_v5 }
 0x15f   :  { %833 = vmatpush1.bf16.msra.mxu0 %v1380_v6 }
 0x160   :  { %834 = vmatprep.subr.bf16.mxu0 %v1385_v7 }
 0x163   :  { %835 = vmatpush1.bf16.msra.mxu0 %v1383_v8 }
 0x164   :  { %836 = vmatprep.subr.bf16.mxu0 %v1388_v9  ;;  %v1137_v9 = vld [vmem:[#allocation2] sm:$0x1] }
 0x167   :  { %837 = vmatpush1.bf16.msra.mxu0 %v1386_v10 }
 0x168   :  { %838 = vmatprep.subr.bf16.mxu0 %v1391_v11  ;;  %v1150_v11 = vand.u32 127, %v357_v21 }
 0x16b   :  { %839 = vmatpush1.bf16.msra.mxu0 %v1389_v12 }
 0x16c   :  { %840 = vmatprep.subr.bf16.mxu0 %v1394_v13  ;;  %v1153_v13 = vsub.s32 %v1150_v11, %v1768_v24 }
 0x16f   :  { %841 = vmatpush1.bf16.msra.mxu0 %v1392_v14 }
 0x170   :  { %842 = vmatprep.subr.bf16.mxu0 %v1397_v15 }
 0x173   :  { %843 = vmatpush1.bf16.msra.mxu0 %v1395_v16 }
 0x174   :  { %844 = vmatprep.subr.bf16.mxu0 %v1400_v17 }
 0x177   :  { %845 = vmatpush1.bf16.msra.mxu0 %v1398_v18 }
 0x178   :  { %846 = vmatprep.subr.bf16.mxu0 %v1403_v19 }
 0x17b   :  { %847 = vmatpush1.bf16.msra.mxu0 %v1401_v20 }
 0x17c   :  { %848 = vmatprep.subr.bf16.mxu0 %v1406_v22 }
 0x17f   :  { %849 = vmatpush1.bf16.msra.mxu0 %v1404_v23 }
 0x180   :  { %850 = vmatprep.subr.bf16.mxu0 %v1409_v25 }
 0x183   :  { %851 = vmatpush1.bf16.msra.mxu0 %v1407_v26 }
 0x184   :  { %852 = vmatprep.subr.bf16.mxu0 %v1412_v27 }
 0x187   :  { %853 = vmatpush1.bf16.msra.mxu0 %v1410_v28 }
 0x188   :  { %854 = vmatprep.subr.bf16.mxu0 %v1415_v29 }
 0x18b   :  { %855 = vmatpush1.bf16.msra.mxu0 %v1413_v30 }
 0x18c   :  { %856 = vmatprep.subr.bf16.mxu0 %v1418_v32 }
 0x18f   :  { %857 = vmatpush1.bf16.msra.mxu0 %v1416_v33 }
 0x192   :  { %859 = vmatmul.mubr.bf16.vlgmr.msra.gmra.mrb[0].mxu0 %v387_v36 }
 0x265   :  { %v860_v44 = vpop.f32.mrb[0].mxu0 }
 0x266   :  { %v1291_v45 = vadd.f32 %v860_v44, %v458_v42  ;;  %v862_v46 = vpop.f32.mrb[1].mxu0 }
 0x267   :  { %v1292_v47 = vadd.f32 %v862_v46, %v462_v43  ;;  %v864_v48 = vpop.f32.mrb[2].mxu0 }
 0x268   :  { %v867_v49 = vmax.f32 %v1291_v45, 0.0  ;;  %v865_v50 = vpop.f32.mrb[3].mxu0 }
 0x269   :  { %v868_v51 = vmax.f32 %v1292_v47, 0.0 }
 0x26a   :  { %v869_v53 = vpack.c.bf16 %v867_v49, %v867_v49 }
 0x26b   :  { %v870_v52 = vpack.c.bf16 %v868_v51, %v868_v51 }
 0x26d   :  { %1107 = vmatprep.mubr.bf16.mxu1 %v870_v52 }
 0x26e   :  { %1108 = vmatmul.mubr.bf16.vlgmr.msra.gmra.mrb[16].mxu1 %v869_v53 }
 0x341   :  { %v1109_v58 = vpop.f32.mrb[16].mxu1 }
 0x342   :  { %v1110_v59 = vadd.f32 %v1109_v58, %v908_v55  ;;  %v1111_v60 = vpop.f32.mrb[17].mxu1 }
 0x343   :  { %v1112_v62 = vadd.f32 %v1111_v60, %v912_v56  ;;  %v1113_v63 = vpop.f32.mrb[18].mxu1 }
 0x344   :  { %v1116_v1 = vmax.f32 %v1110_v59, 0.0  ;;  %v1114_v2 = vpop.f32.mrb[19].mxu1 }
 0x345   :  { %v1117_v3 = vmax.f32 %v1112_v62, 0.0 }
 0x346   :  { %v1130_v4 = vmul.f32 %v1123_v61, %v1116_v1 }
 0x347   :  { %v1131_v5 = vmul.f32 %v1127_v0, %v1117_v3 }
 0x348   :  { %v1132_v6 = vsel %vm132_vm0, %v1130_v4, 0.0 }
 0x349   :  { %v1133_v7 = vsel %vm132_vm0, %v1131_v5, 0.0 }
 0x34a   :  { %v1134_v8 = vadd.f32 %v1133_v7, %v1132_v6 }
 0x34c   :  { %1135 = vadd.xlane.f32.xlu0 %v1134_v8 }
 0x362   :  { %1140 = vperm.xlu0 %1308, %v1137_v9  }
 0x3d9   :  { %v1136_v10 = vpop.xlane.xlu0 %1135 }
 0x3e1   :  { %v1141_v12 = vpop.permute.xlu0 %1140 }
 0x3e2   :  { %v1146_v34 = vrot.slane %v1141_v12, %v1771_v31 }
 0x3e4   :  { %v1147_v14 = vadd.f32 %v1146_v34, %v1136_v10 }
 0x3e6   :  { %v1154_v15 = vrot.slane %v1147_v14, %v1153_v13 }
 0x3e8   :  { %1157 = vst.msk [vmem:[#allocation12] sm:$0x1] %vm1156_vm3, %v1154_v15 }
 0x3e9   :  { %1588 = shalt.err (!%p1585_p2)
}
 0x3ea   :  { %s1589_s0 = scalar_lea.hbm %s1829_s11, 16 }
 0x3eb   :  { %p1590_p3 = scmp.ne.s32.totalorder %s1829_s11, %s1589_s0  ;;  %p1593_p4 = scmp.lt.u32.totalorder %s1589_s0, %s1829_s11 }
 0x3ed   :  { %p1595_p5 = pnand %p1593_p4, %p1590_p3 }
 0x3ef   :  { %1598 = shalt.err (!%p1595_p5)
}
 0x3f0   :  { %1167 = dma.vmem_to_hbm [thread:$0]  %s1165_s9, 16, %s1829_s11, [#allocation5]  }
 0x3f1   :  { %1605 = dma.done.wait [#allocation5], 16  }
 0x3f2   :  { %1606 = vsyncadd [#allocation5], 4294967280 }
 0x3f3   :  { %1171 = vsyncpa [#allocation4], 1 }
 0x3f4   :  { %1172 = vsyncpa [#allocation7], 1 }
 0x3f5   :  { %1173 = vsyncpa [#allocation10], 1 }
 0x3f6   :  { %1174 = vsyncpa [#allocation5], 1 }

</bundles_post_ra>
